<compile_context>
chip_gen: v6e
topology: v6e:2x2x1
jax: 0.10.0
libtpu: 0.0.40
codegen_flags: <defaults>
</compile_context>

<pallas_src>
import jax
import jax.numpy as jnp
from jax.experimental import pallas as pl
from jax.experimental.pallas import tpu as pltpu


def _identity_kernel(x_ref, o_ref):
    # Pure copy: the whole "forward" of IdentityClass.
    o_ref[...] = x_ref[...]


_MAX_TILE_BYTES = 2 * 1024 * 1024  # ~2 MiB per buffer -> <=8 MiB double-buffered


def _lane_dense_2d(shape):
    """Pick a 2D view (rows, cols) with a lane-dense (multiple-of-128) cols."""
    total = 1
    for d in shape:
        total *= d
    for width in (2048, 1024, 512, 256, 128):
        if total % width == 0:
            return total // width, width
    # Fallback: keep the original last dim on the lane axis.
    if len(shape) >= 2:
        return total // shape[-1], shape[-1]
    return 1, total


def _pick_row_tile(rows, cols, itemsize):
    """Row-tile size: ~2 MiB per buffer, multiple of 8 when it tiles rows."""
    row_bytes = max(cols * itemsize, 1)
    tr_cap = max(1, _MAX_TILE_BYTES // row_bytes)
    if rows <= tr_cap:
        tr = rows
        # Give the v7x megacore >= 2 grid steps when it is free to do so.
        if rows > 8:
            half = ((rows + 1) // 2 + 7) // 8 * 8
            if 0 < half < rows:
                tr = half
        return tr
    # Tiling rows: block's second-to-last dim must be a multiple of 8.
    return max(8, (tr_cap // 8) * 8)


@jax.jit
def identity_pallas(x: jax.Array) -> jax.Array:
    """Identity forward: returns x unchanged (same shape, dtype, values)."""
    orig_shape = x.shape
    dtype = x.dtype

    total = 1
    for d in orig_shape:
        total *= d
    if total == 0:
        # Nothing to copy for empty arrays.
        return x

    rows, cols = _lane_dense_2d(orig_shape)
    x2d = x.reshape(rows, cols)

    tr = _pick_row_tile(rows, cols, dtype.itemsize)
    grid = (pl.cdiv(rows, tr),)

    out2d = pl.pallas_call(
        _identity_kernel,
        out_shape=jax.ShapeDtypeStruct((rows, cols), dtype),
        grid=grid,
        in_specs=[pl.BlockSpec((tr, cols), lambda i: (i, 0))],
        out_specs=pl.BlockSpec((tr, cols), lambda i: (i, 0)),
        # Output aliases the input buffer: no extra full-size HBM allocation.
        input_output_aliases={0: 0},
        compiler_params=pltpu.CompilerParams(
            dimension_semantics=("parallel",)
        ),
    )(x2d)

    return out2d.reshape(orig_shape)


if __name__ == "__main__":
    key = jax.random.PRNGKey(0)
    # Small NCHW-style input consistent with typical usage of the module.
    x = jax.random.normal(key, (2, 4, 16, 16), dtype=jnp.float32)

    y = identity_pallas(x)
    jax.block_until_ready(y)

    assert y.shape == x.shape and y.dtype == x.dtype
    assert bool(jnp.all(y == x))
    print("KERNEL_OK")
</pallas_src>

<mosaic_0001>
module attributes {stable_mosaic.version = 11 : i64} {
  func.func @_identity_kernel(%arg0: i32, %arg1: memref<1x2048xf32, #tpu.memory_space<vmem>>, %arg2: memref<1x2048xf32, #tpu.memory_space<vmem>>) attributes {dimension_semantics = [#tpu.dimension_semantics<parallel>], iteration_bounds = array<i64: 1>, scalar_prefetch = 0 : i64, scratch_operands = 0 : i64, tpu.core_type = #tpu.core_type<tc>, window_params = [{transform_indices = @transform_0, window_bounds = array<i64: 1, 2048>}, {transform_indices = @transform_1, window_bounds = array<i64: 1, 2048>}]} {
    %c0 = arith.constant 0 : index
    %c0_0 = arith.constant 0 : index
    %0 = vector.load %arg1[%c0, %c0_0] : memref<1x2048xf32, #tpu.memory_space<vmem>>, vector<1x2048xf32>
    %c0_1 = arith.constant 0 : index
    %c0_2 = arith.constant 0 : index
    %1 = vector.load %arg2[%c0_1, %c0_2] : memref<1x2048xf32, #tpu.memory_space<vmem>>, vector<1x2048xf32>
    tpu.vector_store %arg2[%c0_1, %c0_2], %0 {strides = array<i32>} : memref<1x2048xf32, #tpu.memory_space<vmem>>, vector<1x2048xf32>,
    return
  }
  func.func @transform_0(%arg0: i32) -> (i32, i32) {
    %c0_i32 = arith.constant 0 : i32
    %c0_i32_0 = arith.constant 0 : i32
    return %arg0, %c0_i32 : i32, i32
  }
  func.func @transform_1(%arg0: i32) -> (i32, i32) {
    %c0_i32 = arith.constant 0 : i32
    %c0_i32_0 = arith.constant 0 : i32
    return %arg0, %c0_i32 : i32, i32
  }
}

</mosaic_0001>

<bundles_post_ra>
// kernel: identity_pallas.1
= control target key start
LH: loop header
LB: loop body
LE: loop exit
PB: predicated region body
PF: predicated region fallthrough
CT: control target
= control target key end

     0   :  { %s38_s0 = inlined_call_operand.vmem [shape: f32[1,2048], index: 0, kind: input, shape index: {}, may-alias: {0,1}]   ;;  %s39_s1 = inlined_call_operand.vmem [shape: f32[1,2048], index: 1, kind: output, shape index: {}, may-alias: {0,1}]  }
   0x1   :  { %v8_v0 = vld [vmem:[%s38_s0] sm:$0xff]  ;;  %v9_v1 = vld [vmem:[%s38_s0 + $0x8] sm:$0xff] }
   0x2   :  { %10 = vst [vmem:[%s39_s1] sm:$0xff] %v8_v0  ;;  %11 = vst [vmem:[%s39_s1 + $0x8] sm:$0xff] %v9_v1 }

</bundles_post_ra>
